<compile_context>
chip_gen: v7x
topology: tpu7x:2x2x1
jax: 0.10.0
libtpu: 0.0.40
codegen_flags: <defaults>
</compile_context>

<pallas_src>
from typing import NamedTuple

import jax
import jax.numpy as jnp
from jax.experimental import pallas as pl
from jax.experimental.pallas import tpu as pltpu


class DecoderParams(NamedTuple):
    attn_w: jax.Array   # [H+De, Dd]   attention W^T (rows 0:H hidden part, H:H+De encoder part)
    lstm_w: jax.Array   # [De+5H, 4H]  per-layer stacked [W_ih^T ; W_hh^T] (layer0 drops the x column)
    out_w: jax.Array    # [H+De, nf]   output Linear W^T (rows 0:H h part, H:H+De weighted part)
    aux: jax.Array      # [7, 4H] f32  r0 attn bias | r1 v | r2-4 (b_ih+b_hh) per layer |
                        #              r5 layer-0 W_ih x-column | r6 out bias (lane-padded to 4H)


def prepare_decoder_params(w_attn, b_attn, w_v, lstm_layers, w_out, b_out,
                           compute_dtype=jnp.bfloat16):
    """One-time packing/transposition of all module weights (hoisted out of the decode loop).

    w_attn: [Dd, Dd+De]  (torch Linear; input = cat(hidden, encoder_outputs))
    b_attn: [Dd]
    w_v:    [1, Dd]
    lstm_layers: 3 tuples (W_ih [4H,in], W_hh [4H,H], b_ih [4H], b_hh [4H]), gate order i,f,g,o
    w_out:  [nf, H+De],  b_out: [nf]
    """
    assert len(lstm_layers) == 3, "module hardcodes num_layers=3"
    Dd = w_attn.shape[0]
    De = w_attn.shape[1] - Dd
    H = lstm_layers[0][1].shape[1]
    G = 4 * H
    nf = w_out.shape[0]
    assert Dd == H, "attention projection width must equal decoder hidden dim"
    assert lstm_layers[0][0].shape[1] == De + 1        # layer-0 input = cat(x, weighted)
    assert w_out.shape[1] == H + De                    # head input = cat(h_top, weighted)
    assert Dd <= G and nf <= G

    attn_w = jnp.transpose(w_attn).astype(compute_dtype)                     # [H+De, Dd]

    # Per-layer [input | h_prev] stacked weights -> one matmul per layer in the kernel.
    blocks = [jnp.concatenate([jnp.transpose(lstm_layers[0][0][:, 1:]),      # [De, 4H] (x col dropped)
                               jnp.transpose(lstm_layers[0][1])], axis=0)]   # [H, 4H]
    for l in (1, 2):
        blocks.append(jnp.concatenate([jnp.transpose(lstm_layers[l][0]),     # [H, 4H]
                                       jnp.transpose(lstm_layers[l][1])], axis=0))
    lstm_w = jnp.concatenate(blocks, axis=0).astype(compute_dtype)           # [De+5H, 4H]

    out_w = jnp.transpose(w_out).astype(compute_dtype)                       # [H+De, nf]

    def pad_to_g(v):
        return jnp.pad(v, (0, G - v.shape[0]))

    aux = jnp.stack([
        pad_to_g(b_attn),                                  # 0: attn bias   (width Dd)
        pad_to_g(w_v[0]),                                  # 1: v vector    (width Dd)
        lstm_layers[0][2] + lstm_layers[0][3],             # 2: layer0 fused bias (4H)
        lstm_layers[1][2] + lstm_layers[1][3],             # 3: layer1 fused bias
        lstm_layers[2][2] + lstm_layers[2][3],             # 4: layer2 fused bias
        lstm_layers[0][0][:, 0],                           # 5: layer0 W_ih x-column (4H)
        pad_to_g(b_out),                                   # 6: out bias    (width nf)
    ], axis=0).astype(jnp.float32)                         # [7, 4H] f32 (biases never quantized)

    return DecoderParams(attn_w, lstm_w, out_w, aux)


def _attention_decoder_kernel(x_ref, hid0_ref, cell0_ref, enc_ref,
                              attn_w_ref, lstm_w_ref, out_w_ref, aux_ref,
                              y_ref, hid_out_ref, cell_out_ref,
                              h_sc, c_sc, eproj_sc):
    t = pl.program_id(0)
    S, De = enc_ref.shape
    L, H = h_sc.shape
    Dd = attn_w_ref.shape[1]
    nf = y_ref.shape[1]

    def mm(a, w):
        # MXU matmul: LHS cast to the (possibly bf16) weight dtype, f32 accumulation.
        return jnp.dot(a.astype(w.dtype), w, preferred_element_type=jnp.float32)

    # ---- step 0: load carries, cache the loop-invariant encoder projection (+ attn bias) ----
    @pl.when(t == 0)
    def _():
        h_sc[...] = hid0_ref[...]
        c_sc[...] = cell0_ref[...]
        eproj_sc[...] = mm(enc_ref[...], attn_w_ref[H:H + De, :]) + aux_ref[0:1, 0:Dd]

    enc = enc_ref[...]                   # [S, De] f32
    hid = h_sc[...]                      # [L, H]  f32 (previous step's hidden)
    cel = c_sc[...]                      # [L, H]  f32

    # ---- attention: softmax_S( v . tanh(W[h_top ; enc] + b) ), then context ----
    h_top = hid[2:3, :]                                                     # [1, H]
    h_proj = mm(h_top, attn_w_ref[0:H, :])                                  # [1, Dd]
    energy = jnp.tanh(eproj_sc[...] + h_proj)                               # [S, Dd]
    scores = jnp.sum(energy * aux_ref[1:2, 0:Dd], axis=1, keepdims=True)    # [S, 1]
    m = jnp.max(scores, axis=0, keepdims=True)
    p = jnp.exp(scores - m)                                                 # [S, 1]
    denom = jnp.sum(p, axis=0, keepdims=True)
    weighted = jnp.sum(p * enc, axis=0, keepdims=True) / denom              # [1, De] exact softmax

    # ---- 3-layer LSTM single step (gates i,f,g,o); one MXU push per layer ----
    x_scalar = x_ref[0, t]

    def lstm_cell(gates, c_prev):
        # 3 EUP passes: sigmoid over all 4H gates, tanh over all 4H gates, tanh(c_new)
        sig = jax.nn.sigmoid(gates)
        tnh = jnp.tanh(gates)
        i = sig[:, 0:H]
        f = sig[:, H:2 * H]
        o = sig[:, 3 * H:4 * H]
        g = tnh[:, 2 * H:3 * H]
        c_new = f * c_prev + i * g
        h_new = o * jnp.tanh(c_new)
        return h_new, c_new

    r0 = De + H
    g0 = (mm(jnp.concatenate([weighted, hid[0:1, :]], axis=1), lstm_w_ref[0:r0, :])
          + x_scalar * aux_ref[5:6, :]          # x column of layer-0 W_ih (VPU, keeps 1 push)
          + aux_ref[2:3, :])
    h0, c0 = lstm_cell(g0, cel[0:1, :])

    r1 = r0 + 2 * H
    g1 = (mm(jnp.concatenate([h0, hid[1:2, :]], axis=1), lstm_w_ref[r0:r1, :])
          + aux_ref[3:4, :])
    h1, c1 = lstm_cell(g1, cel[1:2, :])

    r2 = r1 + 2 * H
    g2 = (mm(jnp.concatenate([h1, hid[2:3, :]], axis=1), lstm_w_ref[r1:r2, :])
          + aux_ref[4:5, :])
    h2, c2 = lstm_cell(g2, cel[2:3, :])

    # ---- output head: Linear(cat(h2, weighted)) in one MXU push, f32 bias ----
    y = mm(jnp.concatenate([h2, weighted], axis=1), out_w_ref[...]) + aux_ref[6:7, 0:nf]
    y_ref[...] = y

    # ---- carry the new state; final-state outputs stay VMEM-resident (constant index map) ----
    new_h = jnp.concatenate([h0, h1, h2], axis=0)
    new_c = jnp.concatenate([c0, c1, c2], axis=0)
    h_sc[...] = new_h
    c_sc[...] = new_c
    hid_out_ref[...] = new_h
    cell_out_ref[...] = new_c


@jax.jit
def attention_decoder_decode(x_seq, input_hidden, input_cell, encoder_outputs, params):
    """Fused multi-step decode: T decoder steps in ONE pallas_call (grid=(T,)).

    x_seq:           [T] scalar decoder inputs (one per step)
    input_hidden:    [3, 1, H]
    input_cell:      [3, 1, H]
    encoder_outputs: [1, S, De]
    returns: (ys [T, nf], hidden_T [3, 1, H], cell_T [3, 1, H])
    """
    L, _, H = input_hidden.shape
    _, S, De = encoder_outputs.shape
    attn_w, lstm_w, out_w, aux = params
    Dd = attn_w.shape[1]
    nf = out_w.shape[1]
    assert L == 3

    xs = jnp.asarray(x_seq, jnp.float32).reshape(1, -1)            # [1, T] (SMEM)
    T = xs.shape[1]
    hid = input_hidden.astype(jnp.float32).reshape(L, H)
    cel = input_cell.astype(jnp.float32).reshape(L, H)
    enc = encoder_outputs.astype(jnp.float32).reshape(S, De)

    smem = pltpu.MemorySpace.SMEM
    ys, hid_n, cell_n = pl.pallas_call(
        _attention_decoder_kernel,
        out_shape=(
            jax.ShapeDtypeStruct((T, nf), jnp.float32),
            jax.ShapeDtypeStruct((L, H), jnp.float32),
            jax.ShapeDtypeStruct((L, H), jnp.float32),
        ),
        grid_spec=pltpu.PrefetchScalarGridSpec(
            num_scalar_prefetch=0,
            grid=(T,),
            in_specs=[
                pl.BlockSpec((1, T), lambda t: (0, 0), memory_space=smem),   # per-step x scalars
                pl.BlockSpec((L, H), lambda t: (0, 0)),                      # initial hidden
                pl.BlockSpec((L, H), lambda t: (0, 0)),                      # initial cell
                pl.BlockSpec((S, De), lambda t: (0, 0)),                     # encoder outputs (resident)
                pl.BlockSpec(attn_w.shape, lambda t: (0, 0)),                # attention W^T (resident)
                pl.BlockSpec(lstm_w.shape, lambda t: (0, 0)),                # LSTM weight slab (resident)
                pl.BlockSpec(out_w.shape, lambda t: (0, 0)),                 # head W^T (resident)
                pl.BlockSpec(aux.shape, lambda t: (0, 0)),                   # f32 biases / v / x-column
            ],
            out_specs=(
                pl.BlockSpec((1, nf), lambda t: (t, 0)),                     # y per step
                pl.BlockSpec((L, H), lambda t: (0, 0)),                      # final hidden
                pl.BlockSpec((L, H), lambda t: (0, 0)),                      # final cell
            ),
            scratch_shapes=[
                pltpu.VMEM((L, H), jnp.float32),      # h carry
                pltpu.VMEM((L, H), jnp.float32),      # c carry
                pltpu.VMEM((S, Dd), jnp.float32),     # cached enc @ W_enc + b (loop-invariant)
            ],
        ),
        compiler_params=pltpu.CompilerParams(dimension_semantics=("arbitrary",)),
    )(xs, hid, cel, enc, attn_w, lstm_w, out_w, aux)

    return ys, hid_n.reshape(L, 1, H), cell_n.reshape(L, 1, H)


def attention_decoder_forward(x, input_hidden, input_cell, encoder_outputs, params):
    """Single decode step — exact equivalent of AttentionDecoder.forward (eval mode)."""
    y, hid_n, cell_n = attention_decoder_decode(
        jnp.reshape(jnp.asarray(x, jnp.float32), (1,)),
        input_hidden, input_cell, encoder_outputs, params)
    return y, hid_n, cell_n


# ----------------------------- pure-JAX reference (mirrors PyTorch) -----------------------------
def _reference_forward(x, input_hidden, input_cell, encoder_outputs,
                       w_attn, b_attn, w_v, lstm_layers, w_out, b_out):
    S = encoder_outputs.shape[1]
    h = jnp.tile(input_hidden[2:3], (1, S, 1))                       # hidden[2:3].repeat(1,S,1)
    cat = jnp.concatenate([h, encoder_outputs], axis=2)
    energy = jnp.tanh(cat @ w_attn.T + b_attn)
    attention = (energy @ w_v.T)[..., 0]                             # [1, S]
    a = jax.nn.softmax(attention, axis=1)[:, None, :]                # [1, 1, S]
    weighted = jnp.matmul(a, encoder_outputs)                        # [1, 1, De]
    x3 = jnp.reshape(x, (1, 1, 1))
    rnn_input = jnp.concatenate([x3, weighted], axis=2)              # [1, 1, De+1]
    inp = rnn_input[0]                                               # [1, De+1]
    hs, cs = [], []
    for l, (W_ih, W_hh, b_ih, b_hh) in enumerate(lstm_layers):
        h_prev, c_prev = input_hidden[l], input_cell[l]
        H = h_prev.shape[-1]
        gates = inp @ W_ih.T + b_ih + h_prev @ W_hh.T + b_hh
        i = jax.nn.sigmoid(gates[:, 0:H]); f = jax.nn.sigmoid(gates[:, H:2 * H])
        g = jnp.tanh(gates[:, 2 * H:3 * H]); o = jax.nn.sigmoid(gates[:, 3 * H:4 * H])
        c_new = f * c_prev + i * g
        h_new = o * jnp.tanh(c_new)
        hs.append(h_new); cs.append(c_new)
        inp = h_new
    output = hs[-1]
    weighted2 = weighted[0]
    y = jnp.concatenate([output, weighted2], axis=1) @ w_out.T + b_out
    return y, jnp.stack(hs, axis=0), jnp.stack(cs, axis=0)


def _reference_decode(x_seq, input_hidden, input_cell, encoder_outputs,
                      w_attn, b_attn, w_v, lstm_layers, w_out, b_out):
    h, c = input_hidden, input_cell
    ys = []
    for t in range(x_seq.shape[0]):
        y, h, c = _reference_forward(x_seq[t], h, c, encoder_outputs,
                                     w_attn, b_attn, w_v, lstm_layers, w_out, b_out)
        ys.append(y)
    return jnp.concatenate(ys, axis=0), h, c


if __name__ == "__main__":
    S = 8     # src_len
    H = 32    # input_dim == decoder hidden dim (4H = 128 -> one full lane row of gates)
    De = 32   # encoder_hidden_state (must equal H for the module's output_layer cat to be valid)
    NF = 1    # n_features
    L = 3     # LSTM layers (hardcoded in the module)
    T = 6     # number of fused decode steps

    key = jax.random.PRNGKey(0)
    kit = iter(jax.random.split(key, 32))

    # Runtime inputs
    x = jax.random.normal(next(kit), (1, 1, 1), dtype=jnp.float32)
    x_seq = jax.random.normal(next(kit), (T,), dtype=jnp.float32)
    input_hidden = jax.random.normal(next(kit), (L, 1, H), dtype=jnp.float32)
    input_cell = jax.random.normal(next(kit), (L, 1, H), dtype=jnp.float32)
    encoder_outputs = jax.random.normal(next(kit), (1, S, De), dtype=jnp.float32)

    # Attention parameters (torch Linear-style uniform init)
    b_a = 1.0 / float(H + De) ** 0.5
    w_attn = jax.random.uniform(next(kit), (H, H + De), minval=-b_a, maxval=b_a, dtype=jnp.float32)
    b_attn = jax.random.uniform(next(kit), (H,), minval=-b_a, maxval=b_a, dtype=jnp.float32)
    b_v = 1.0 / float(H) ** 0.5
    w_v = jax.random.uniform(next(kit), (1, H), minval=-b_v, maxval=b_v, dtype=jnp.float32)

    # LSTM parameters: 3 layers, gate order (i, f, g, o); layer-0 input size = De + 1
    bound = 1.0 / float(H) ** 0.5
    lstm_layers = []
    for l in range(L):
        in_dim = De + 1 if l == 0 else H
        W_ih = jax.random.uniform(next(kit), (4 * H, in_dim), minval=-bound, maxval=bound, dtype=jnp.float32)
        W_hh = jax.random.uniform(next(kit), (4 * H, H), minval=-bound, maxval=bound, dtype=jnp.float32)
        b_ih = jax.random.uniform(next(kit), (4 * H,), minval=-bound, maxval=bound, dtype=jnp.float32)
        b_hh = jax.random.uniform(next(kit), (4 * H,), minval=-bound, maxval=bound, dtype=jnp.float32)
        lstm_layers.append((W_ih, W_hh, b_ih, b_hh))

    # Output layer
    b_o = 1.0 / float(2 * H) ** 0.5
    w_out = jax.random.uniform(next(kit), (NF, 2 * H), minval=-b_o, maxval=b_o, dtype=jnp.float32)
    b_out = jax.random.uniform(next(kit), (NF,), minval=-b_o, maxval=b_o, dtype=jnp.float32)

    # ---------------- single-step check (exact module forward semantics) ----------------
    ref_y, ref_hn, ref_cn = _reference_forward(
        x, input_hidden, input_cell, encoder_outputs,
        w_attn, b_attn, w_v, lstm_layers, w_out, b_out)

    params_f32 = prepare_decoder_params(w_attn, b_attn, w_v, lstm_layers, w_out, b_out,
                                        compute_dtype=jnp.float32)
    y, hn, cn = attention_decoder_forward(x, input_hidden, input_cell, encoder_outputs, params_f32)
    (y, hn, cn) = jax.block_until_ready((y, hn, cn))
    assert y.shape == (1, NF) and hn.shape == (L, 1, H) and cn.shape == (L, 1, H)
    assert jnp.allclose(y, ref_y, atol=5e-3, rtol=5e-3), (y, ref_y)
    assert jnp.allclose(hn, ref_hn, atol=5e-3, rtol=5e-3)
    assert jnp.allclose(cn, ref_cn, atol=5e-3, rtol=5e-3)

    params_bf16 = prepare_decoder_params(w_attn, b_attn, w_v, lstm_layers, w_out, b_out,
                                         compute_dtype=jnp.bfloat16)
    y2, hn2, cn2 = attention_decoder_forward(x, input_hidden, input_cell, encoder_outputs, params_bf16)
    (y2, hn2, cn2) = jax.block_until_ready((y2, hn2, cn2))
    assert jnp.allclose(y2, ref_y, atol=3e-2, rtol=3e-2), (y2, ref_y)
    assert jnp.allclose(hn2, ref_hn, atol=3e-2, rtol=3e-2)
    assert jnp.allclose(cn2, ref_cn, atol=3e-2, rtol=3e-2)

    # ---------------- fused multi-step decode check (weights resident across T steps) ----------------
    ref_ys, ref_hT, ref_cT = _reference_decode(
        x_seq, input_hidden, input_cell, encoder_outputs,
        w_attn, b_attn, w_v, lstm_layers, w_out, b_out)

    ys, hT, cT = attention_decoder_decode(x_seq, input_hidden, input_cell, encoder_outputs, params_f32)
    (ys, hT, cT) = jax.block_until_ready((ys, hT, cT))
    assert ys.shape == (T, NF) and hT.shape == (L, 1, H) and cT.shape == (L, 1, H)
    assert jnp.allclose(ys, ref_ys, atol=1e-2, rtol=1e-2), (ys, ref_ys)
    assert jnp.allclose(hT, ref_hT, atol=1e-2, rtol=1e-2)
    assert jnp.allclose(cT, ref_cT, atol=1e-2, rtol=1e-2)

    ys2, hT2, cT2 = attention_decoder_decode(x_seq, input_hidden, input_cell, encoder_outputs, params_bf16)
    (ys2, hT2, cT2) = jax.block_until_ready((ys2, hT2, cT2))
    assert jnp.allclose(ys2, ref_ys, atol=6e-2, rtol=6e-2), (ys2, ref_ys)
    assert jnp.allclose(hT2, ref_hT, atol=6e-2, rtol=6e-2)
    assert jnp.allclose(cT2, ref_cT, atol=6e-2, rtol=6e-2)

    print("KERNEL_OK")
</pallas_src>

<mosaic_0001>
module attributes {stable_mosaic.version = 11 : i64} {
  func.func @_attention_decoder_kernel(%arg0: i32, %arg1: memref<1x1xf32, #tpu.memory_space<smem>>, %arg2: memref<3x32xf32, #tpu.memory_space<vmem>>, %arg3: memref<3x32xf32, #tpu.memory_space<vmem>>, %arg4: memref<8x32xf32, #tpu.memory_space<vmem>>, %arg5: memref<64x32xf32, #tpu.memory_space<vmem>>, %arg6: memref<192x128xf32, #tpu.memory_space<vmem>>, %arg7: memref<64x1xf32, #tpu.memory_space<vmem>>, %arg8: memref<7x128xf32, #tpu.memory_space<vmem>>, %arg9: memref<1x1xf32, #tpu.memory_space<vmem>>, %arg10: memref<3x32xf32, #tpu.memory_space<vmem>>, %arg11: memref<3x32xf32, #tpu.memory_space<vmem>>, %arg12: memref<3x32xf32, #tpu.memory_space<vmem>>, %arg13: memref<3x32xf32, #tpu.memory_space<vmem>>, %arg14: memref<8x32xf32, #tpu.memory_space<vmem>>) attributes {dimension_semantics = [#tpu.dimension_semantics<arbitrary>], iteration_bounds = array<i64: 1>, scalar_prefetch = 0 : i64, scratch_operands = 3 : i64, tpu.core_type = #tpu.core_type<tc>, window_params = [{transform_indices = @transform_0, window_bounds = array<i64: 1, 1>}, {pipeline_mode = #tpu.pipeline_mode<synchronous>, transform_indices = @transform_1, window_bounds = array<i64: 3, 32>}, {pipeline_mode = #tpu.pipeline_mode<synchronous>, transform_indices = @transform_2, window_bounds = array<i64: 3, 32>}, {pipeline_mode = #tpu.pipeline_mode<synchronous>, transform_indices = @transform_3, window_bounds = array<i64: 8, 32>}, {pipeline_mode = #tpu.pipeline_mode<synchronous>, transform_indices = @transform_4, window_bounds = array<i64: 64, 32>}, {pipeline_mode = #tpu.pipeline_mode<synchronous>, transform_indices = @transform_5, window_bounds = array<i64: 192, 128>}, {pipeline_mode = #tpu.pipeline_mode<synchronous>, transform_indices = @transform_6, window_bounds = array<i64: 64, 1>}, {pipeline_mode = #tpu.pipeline_mode<synchronous>, transform_indices = @transform_7, window_bounds = array<i64: 7, 128>}, {transform_indices = @transform_8, window_bounds = array<i64: 1, 1>}, {pipeline_mode = #tpu.pipeline_mode<synchronous>, transform_indices = @transform_9, window_bounds = array<i64: 3, 32>}, {pipeline_mode = #tpu.pipeline_mode<synchronous>, transform_indices = @transform_10, window_bounds = array<i64: 3, 32>}]} {
    %c0_i32 = arith.constant 0 : i32
    %0 = arith.cmpi eq, %arg0, %c0_i32 : i32
    %1 = arith.extui %0 : i1 to i32
    %c0_i32_0 = arith.constant 0 : i32
    %2 = arith.cmpi ne, %1, %c0_i32_0 : i32
    scf.if %2 {
      %c0_44 = arith.constant 0 : index
      %c0_45 = arith.constant 0 : index
      %115 = vector.load %arg2[%c0_44, %c0_45] : memref<3x32xf32, #tpu.memory_space<vmem>>, vector<3x32xf32>
      %c0_46 = arith.constant 0 : index
      %c0_47 = arith.constant 0 : index
      %116 = vector.load %arg12[%c0_46, %c0_47] : memref<3x32xf32, #tpu.memory_space<vmem>>, vector<3x32xf32>
      tpu.vector_store %arg12[%c0_46, %c0_47], %115 {strides = array<i32>} : memref<3x32xf32, #tpu.memory_space<vmem>>, vector<3x32xf32>,
      %c0_48 = arith.constant 0 : index
      %c0_49 = arith.constant 0 : index
      %117 = vector.load %arg3[%c0_48, %c0_49] : memref<3x32xf32, #tpu.memory_space<vmem>>, vector<3x32xf32>
      %c0_50 = arith.constant 0 : index
      %c0_51 = arith.constant 0 : index
      %118 = vector.load %arg13[%c0_50, %c0_51] : memref<3x32xf32, #tpu.memory_space<vmem>>, vector<3x32xf32>
      tpu.vector_store %arg13[%c0_50, %c0_51], %117 {strides = array<i32>} : memref<3x32xf32, #tpu.memory_space<vmem>>, vector<3x32xf32>,
      %c0_52 = arith.constant 0 : index
      %c0_53 = arith.constant 0 : index
      %119 = vector.load %arg4[%c0_52, %c0_53] : memref<8x32xf32, #tpu.memory_space<vmem>>, vector<8x32xf32>
      %c32 = arith.constant 32 : index
      %c0_54 = arith.constant 0 : index
      %120 = vector.load %arg5[%c32, %c0_54] : memref<64x32xf32, #tpu.memory_space<vmem>>, vector<32x32xf32>
      %cst_55 = arith.constant dense<0.000000e+00> : vector<8x32xf32>
      %121 = tpu.matmul %119, %120, %cst_55 {dimension_numbers = #tpu.dot_dimension_numbers<[1], [0], [0], [1], [0, 0, 1, 1], [], []>} : vector<8x32xf32>, vector<32x32xf32>, vector<8x32xf32> -> vector<8x32xf32>
      %c0_56 = arith.constant 0 : index
      %c0_57 = arith.constant 0 : index
      %122 = vector.load %arg8[%c0_56, %c0_57] : memref<7x128xf32, #tpu.memory_space<vmem>>, vector<1x32xf32>
      %123 = vector.broadcast %122 : vector<1x32xf32> to vector<8x32xf32>
      %124 = arith.addf %121, %123 : vector<8x32xf32>
      %c0_58 = arith.constant 0 : index
      %c0_59 = arith.constant 0 : index
      %125 = vector.load %arg14[%c0_58, %c0_59] : memref<8x32xf32, #tpu.memory_space<vmem>>, vector<8x32xf32>
      tpu.vector_store %arg14[%c0_58, %c0_59], %124 {strides = array<i32>} : memref<8x32xf32, #tpu.memory_space<vmem>>, vector<8x32xf32>,
    } else {
    }
    %c0 = arith.constant 0 : index
    %c0_1 = arith.constant 0 : index
    %3 = vector.load %arg4[%c0, %c0_1] : memref<8x32xf32, #tpu.memory_space<vmem>>, vector<8x32xf32>
    %c0_2 = arith.constant 0 : index
    %c0_3 = arith.constant 0 : index
    %4 = vector.load %arg12[%c0_2, %c0_3] : memref<3x32xf32, #tpu.memory_space<vmem>>, vector<3x32xf32>
    %c0_4 = arith.constant 0 : index
    %c0_5 = arith.constant 0 : index
    %5 = vector.load %arg13[%c0_4, %c0_5] : memref<3x32xf32, #tpu.memory_space<vmem>>, vector<3x32xf32>
    %6 = vector.extract_strided_slice %4 {offsets = [2, 0], sizes = [1, 32], strides = [1, 1]} : vector<3x32xf32> to vector<1x32xf32>
    %c0_6 = arith.constant 0 : index
    %c0_7 = arith.constant 0 : index
    %7 = vector.load %arg5[%c0_6, %c0_7] : memref<64x32xf32, #tpu.memory_space<vmem>>, vector<32x32xf32>
    %cst = arith.constant dense<0.000000e+00> : vector<1x32xf32>
    %8 = tpu.matmul %6, %7, %cst {dimension_numbers = #tpu.dot_dimension_numbers<[1], [0], [0], [1], [0, 0, 1, 1], [], []>} : vector<1x32xf32>, vector<32x32xf32>, vector<1x32xf32> -> vector<1x32xf32>
    %c0_8 = arith.constant 0 : index
    %c0_9 = arith.constant 0 : index
    %9 = vector.load %arg14[%c0_8, %c0_9] : memref<8x32xf32, #tpu.memory_space<vmem>>, vector<8x32xf32>
    %10 = vector.broadcast %8 : vector<1x32xf32> to vector<8x32xf32>
    %11 = arith.addf %9, %10 : vector<8x32xf32>
    %12 = math.tanh %11 : vector<8x32xf32>
    %c1 = arith.constant 1 : index
    %c0_10 = arith.constant 0 : index
    %13 = vector.load %arg8[%c1, %c0_10] : memref<7x128xf32, #tpu.memory_space<vmem>>, vector<1x32xf32>
    %14 = vector.broadcast %13 : vector<1x32xf32> to vector<8x32xf32>
    %15 = arith.mulf %12, %14 : vector<8x32xf32>
    %cst_11 = arith.constant dense<0.000000e+00> : vector<8xf32>
    %16 = vector.multi_reduction <add>, %15, %cst_11 [1] : vector<8x32xf32> to vector<8xf32>
    %17 = vector.shape_cast %16 : vector<8xf32> to vector<8x1xf32>
    %cst_12 = arith.constant dense<0xFF800000> : vector<1xf32>
    %18 = vector.multi_reduction <maximumf>, %17, %cst_12 [0] : vector<8x1xf32> to vector<1xf32>
    %19 = vector.shape_cast %18 : vector<1xf32> to vector<1x1xf32>
    %20 = vector.broadcast %19 : vector<1x1xf32> to vector<8x1xf32>
    %21 = arith.subf %17, %20 : vector<8x1xf32>
    %22 = math.exp %21 : vector<8x1xf32>
    %cst_13 = arith.constant dense<0.000000e+00> : vector<1xf32>
    %23 = vector.multi_reduction <add>, %22, %cst_13 [0] : vector<8x1xf32> to vector<1xf32>
    %24 = vector.shape_cast %23 : vector<1xf32> to vector<1x1xf32>
    %25 = vector.broadcast %22 : vector<8x1xf32> to vector<8x32xf32>
    %26 = arith.mulf %25, %3 : vector<8x32xf32>
    %cst_14 = arith.constant dense<0.000000e+00> : vector<32xf32>
    %27 = vector.multi_reduction <add>, %26, %cst_14 [0] : vector<8x32xf32> to vector<32xf32>
    %28 = vector.shape_cast %27 : vector<32xf32> to vector<1x32xf32>
    %29 = vector.broadcast %24 : vector<1x1xf32> to vector<1x32xf32>
    %30 = arith.divf %28, %29 : vector<1x32xf32>
    %c0_15 = arith.constant 0 : index
    %31 = arith.index_cast %arg0 : i32 to index
    %32 = memref.load %arg1[%c0_15, %31] : memref<1x1xf32, #tpu.memory_space<smem>>
    %33 = vector.extract_strided_slice %4 {offsets = [0, 0], sizes = [1, 32], strides = [1, 1]} : vector<3x32xf32> to vector<1x32xf32>
    %34 = tpu.concatenate %30, %33 in 1 : vector<1x32xf32>, vector<1x32xf32> -> vector<1x64xf32>
    %c0_16 = arith.constant 0 : index
    %c0_17 = arith.constant 0 : index
    %35 = vector.load %arg6[%c0_16, %c0_17] : memref<192x128xf32, #tpu.memory_space<vmem>>, vector<64x128xf32>
    %cst_18 = arith.constant dense<0.000000e+00> : vector<1x128xf32>
    %36 = tpu.matmul %34, %35, %cst_18 {dimension_numbers = #tpu.dot_dimension_numbers<[1], [0], [0], [1], [0, 0, 1, 1], [], []>} : vector<1x64xf32>, vector<64x128xf32>, vector<1x128xf32> -> vector<1x128xf32>
    %c5 = arith.constant 5 : index
    %c0_19 = arith.constant 0 : index
    %37 = vector.load %arg8[%c5, %c0_19] : memref<7x128xf32, #tpu.memory_space<vmem>>, vector<1x128xf32>
    %38 = vector.broadcast %32 : f32 to vector<1x128xf32>
    %39 = arith.mulf %38, %37 : vector<1x128xf32>
    %40 = arith.addf %36, %39 : vector<1x128xf32>
    %c2 = arith.constant 2 : index
    %c0_20 = arith.constant 0 : index
    %41 = vector.load %arg8[%c2, %c0_20] : memref<7x128xf32, #tpu.memory_space<vmem>>, vector<1x128xf32>
    %42 = arith.addf %40, %41 : vector<1x128xf32>
    %43 = vector.extract_strided_slice %5 {offsets = [0, 0], sizes = [1, 32], strides = [1, 1]} : vector<3x32xf32> to vector<1x32xf32>
    %44 = arith.negf %42 : vector<1x128xf32>
    %45 = math.exp %44 : vector<1x128xf32>
    %cst_21 = arith.constant 1.000000e+00 : f32
    %46 = vector.broadcast %cst_21 : f32 to vector<1x128xf32>
    %47 = arith.addf %46, %45 : vector<1x128xf32>
    %48 = arith.divf %46, %47 : vector<1x128xf32>
    %49 = math.tanh %42 : vector<1x128xf32>
    %50 = vector.extract_strided_slice %48 {offsets = [0, 0], sizes = [1, 32], strides = [1, 1]} : vector<1x128xf32> to vector<1x32xf32>
    %51 = vector.extract_strided_slice %48 {offsets = [0, 32], sizes = [1, 32], strides = [1, 1]} : vector<1x128xf32> to vector<1x32xf32>
    %52 = vector.extract_strided_slice %48 {offsets = [0, 96], sizes = [1, 32], strides = [1, 1]} : vector<1x128xf32> to vector<1x32xf32>
    %53 = vector.extract_strided_slice %49 {offsets = [0, 64], sizes = [1, 32], strides = [1, 1]} : vector<1x128xf32> to vector<1x32xf32>
    %54 = arith.mulf %51, %43 : vector<1x32xf32>
    %55 = arith.mulf %50, %53 : vector<1x32xf32>
    %56 = arith.addf %54, %55 : vector<1x32xf32>
    %57 = math.tanh %56 : vector<1x32xf32>
    %58 = arith.mulf %52, %57 : vector<1x32xf32>
    %59 = vector.extract_strided_slice %4 {offsets = [1, 0], sizes = [1, 32], strides = [1, 1]} : vector<3x32xf32> to vector<1x32xf32>
    %60 = tpu.concatenate %58, %59 in 1 : vector<1x32xf32>, vector<1x32xf32> -> vector<1x64xf32>
    %c64 = arith.constant 64 : index
    %c0_22 = arith.constant 0 : index
    %61 = vector.load %arg6[%c64, %c0_22] : memref<192x128xf32, #tpu.memory_space<vmem>>, vector<64x128xf32>
    %cst_23 = arith.constant dense<0.000000e+00> : vector<1x128xf32>
    %62 = tpu.matmul %60, %61, %cst_23 {dimension_numbers = #tpu.dot_dimension_numbers<[1], [0], [0], [1], [0, 0, 1, 1], [], []>} : vector<1x64xf32>, vector<64x128xf32>, vector<1x128xf32> -> vector<1x128xf32>
    %c3 = arith.constant 3 : index
    %c0_24 = arith.constant 0 : index
    %63 = vector.load %arg8[%c3, %c0_24] : memref<7x128xf32, #tpu.memory_space<vmem>>, vector<1x128xf32>
    %64 = arith.addf %62, %63 : vector<1x128xf32>
    %65 = vector.extract_strided_slice %5 {offsets = [1, 0], sizes = [1, 32], strides = [1, 1]} : vector<3x32xf32> to vector<1x32xf32>
    %66 = arith.negf %64 : vector<1x128xf32>
    %67 = math.exp %66 : vector<1x128xf32>
    %cst_25 = arith.constant 1.000000e+00 : f32
    %68 = vector.broadcast %cst_25 : f32 to vector<1x128xf32>
    %69 = arith.addf %68, %67 : vector<1x128xf32>
    %70 = arith.divf %68, %69 : vector<1x128xf32>
    %71 = math.tanh %64 : vector<1x128xf32>
    %72 = vector.extract_strided_slice %70 {offsets = [0, 0], sizes = [1, 32], strides = [1, 1]} : vector<1x128xf32> to vector<1x32xf32>
    %73 = vector.extract_strided_slice %70 {offsets = [0, 32], sizes = [1, 32], strides = [1, 1]} : vector<1x128xf32> to vector<1x32xf32>
    %74 = vector.extract_strided_slice %70 {offsets = [0, 96], sizes = [1, 32], strides = [1, 1]} : vector<1x128xf32> to vector<1x32xf32>
    %75 = vector.extract_strided_slice %71 {offsets = [0, 64], sizes = [1, 32], strides = [1, 1]} : vector<1x128xf32> to vector<1x32xf32>
    %76 = arith.mulf %73, %65 : vector<1x32xf32>
    %77 = arith.mulf %72, %75 : vector<1x32xf32>
    %78 = arith.addf %76, %77 : vector<1x32xf32>
    %79 = math.tanh %78 : vector<1x32xf32>
    %80 = arith.mulf %74, %79 : vector<1x32xf32>
    %81 = vector.extract_strided_slice %4 {offsets = [2, 0], sizes = [1, 32], strides = [1, 1]} : vector<3x32xf32> to vector<1x32xf32>
    %82 = tpu.concatenate %80, %81 in 1 : vector<1x32xf32>, vector<1x32xf32> -> vector<1x64xf32>
    %c128 = arith.constant 128 : index
    %c0_26 = arith.constant 0 : index
    %83 = vector.load %arg6[%c128, %c0_26] : memref<192x128xf32, #tpu.memory_space<vmem>>, vector<64x128xf32>
    %cst_27 = arith.constant dense<0.000000e+00> : vector<1x128xf32>
    %84 = tpu.matmul %82, %83, %cst_27 {dimension_numbers = #tpu.dot_dimension_numbers<[1], [0], [0], [1], [0, 0, 1, 1], [], []>} : vector<1x64xf32>, vector<64x128xf32>, vector<1x128xf32> -> vector<1x128xf32>
    %c4 = arith.constant 4 : index
    %c0_28 = arith.constant 0 : index
    %85 = vector.load %arg8[%c4, %c0_28] : memref<7x128xf32, #tpu.memory_space<vmem>>, vector<1x128xf32>
    %86 = arith.addf %84, %85 : vector<1x128xf32>
    %87 = vector.extract_strided_slice %5 {offsets = [2, 0], sizes = [1, 32], strides = [1, 1]} : vector<3x32xf32> to vector<1x32xf32>
    %88 = arith.negf %86 : vector<1x128xf32>
    %89 = math.exp %88 : vector<1x128xf32>
    %cst_29 = arith.constant 1.000000e+00 : f32
    %90 = vector.broadcast %cst_29 : f32 to vector<1x128xf32>
    %91 = arith.addf %90, %89 : vector<1x128xf32>
    %92 = arith.divf %90, %91 : vector<1x128xf32>
    %93 = math.tanh %86 : vector<1x128xf32>
    %94 = vector.extract_strided_slice %92 {offsets = [0, 0], sizes = [1, 32], strides = [1, 1]} : vector<1x128xf32> to vector<1x32xf32>
    %95 = vector.extract_strided_slice %92 {offsets = [0, 32], sizes = [1, 32], strides = [1, 1]} : vector<1x128xf32> to vector<1x32xf32>
    %96 = vector.extract_strided_slice %92 {offsets = [0, 96], sizes = [1, 32], strides = [1, 1]} : vector<1x128xf32> to vector<1x32xf32>
    %97 = vector.extract_strided_slice %93 {offsets = [0, 64], sizes = [1, 32], strides = [1, 1]} : vector<1x128xf32> to vector<1x32xf32>
    %98 = arith.mulf %95, %87 : vector<1x32xf32>
    %99 = arith.mulf %94, %97 : vector<1x32xf32>
    %100 = arith.addf %98, %99 : vector<1x32xf32>
    %101 = math.tanh %100 : vector<1x32xf32>
    %102 = arith.mulf %96, %101 : vector<1x32xf32>
    %103 = tpu.concatenate %102, %30 in 1 : vector<1x32xf32>, vector<1x32xf32> -> vector<1x64xf32>
    %c0_30 = arith.constant 0 : index
    %c0_31 = arith.constant 0 : index
    %104 = vector.load %arg7[%c0_30, %c0_31] : memref<64x1xf32, #tpu.memory_space<vmem>>, vector<64x1xf32>
    %cst_32 = arith.constant dense<0.000000e+00> : vector<1x1xf32>
    %105 = tpu.matmul %103, %104, %cst_32 {dimension_numbers = #tpu.dot_dimension_numbers<[1], [0], [0], [1], [0, 0, 1, 1], [], []>} : vector<1x64xf32>, vector<64x1xf32>, vector<1x1xf32> -> vector<1x1xf32>
    %c6 = arith.constant 6 : index
    %c0_33 = arith.constant 0 : index
    %106 = vector.load %arg8[%c6, %c0_33] : memref<7x128xf32, #tpu.memory_space<vmem>>, vector<1x1xf32>
    %107 = arith.addf %105, %106 : vector<1x1xf32>
    %c0_34 = arith.constant 0 : index
    %c0_35 = arith.constant 0 : index
    %108 = vector.load %arg9[%c0_34, %c0_35] : memref<1x1xf32, #tpu.memory_space<vmem>>, vector<1x1xf32>
    tpu.vector_store %arg9[%c0_34, %c0_35], %107 {strides = array<i32>} : memref<1x1xf32, #tpu.memory_space<vmem>>, vector<1x1xf32>,
    %109 = tpu.concatenate %58, %80, %102 in 0 : vector<1x32xf32>, vector<1x32xf32>, vector<1x32xf32> -> vector<3x32xf32>
    %110 = tpu.concatenate %56, %78, %100 in 0 : vector<1x32xf32>, vector<1x32xf32>, vector<1x32xf32> -> vector<3x32xf32>
    %c0_36 = arith.constant 0 : index
    %c0_37 = arith.constant 0 : index
    %111 = vector.load %arg12[%c0_36, %c0_37] : memref<3x32xf32, #tpu.memory_space<vmem>>, vector<3x32xf32>
    tpu.vector_store %arg12[%c0_36, %c0_37], %109 {strides = array<i32>} : memref<3x32xf32, #tpu.memory_space<vmem>>, vector<3x32xf32>,
    %c0_38 = arith.constant 0 : index
    %c0_39 = arith.constant 0 : index
    %112 = vector.load %arg13[%c0_38, %c0_39] : memref<3x32xf32, #tpu.memory_space<vmem>>, vector<3x32xf32>
    tpu.vector_store %arg13[%c0_38, %c0_39], %110 {strides = array<i32>} : memref<3x32xf32, #tpu.memory_space<vmem>>, vector<3x32xf32>,
    %c0_40 = arith.constant 0 : index
    %c0_41 = arith.constant 0 : index
    %113 = vector.load %arg10[%c0_40, %c0_41] : memref<3x32xf32, #tpu.memory_space<vmem>>, vector<3x32xf32>
    tpu.vector_store %arg10[%c0_40, %c0_41], %109 {strides = array<i32>} : memref<3x32xf32, #tpu.memory_space<vmem>>, vector<3x32xf32>,
    %c0_42 = arith.constant 0 : index
    %c0_43 = arith.constant 0 : index
    %114 = vector.load %arg11[%c0_42, %c0_43] : memref<3x32xf32, #tpu.memory_space<vmem>>, vector<3x32xf32>
    tpu.vector_store %arg11[%c0_42, %c0_43], %110 {strides = array<i32>} : memref<3x32xf32, #tpu.memory_space<vmem>>, vector<3x32xf32>,
    return
  }
  func.func @transform_0(%arg0: i32) -> (i32, i32) {
    %c0_i32 = arith.constant 0 : i32
    %c0_i32_0 = arith.constant 0 : i32
    %c0_i32_1 = arith.constant 0 : i32
    return %c0_i32, %c0_i32_0 : i32, i32
  }
  func.func @transform_1(%arg0: i32) -> (i32, i32) {
    %c0_i32 = arith.constant 0 : i32
    %c0_i32_0 = arith.constant 0 : i32
    %c0_i32_1 = arith.constant 0 : i32
    return %c0_i32, %c0_i32_0 : i32, i32
  }
  func.func @transform_2(%arg0: i32) -> (i32, i32) {
    %c0_i32 = arith.constant 0 : i32
    %c0_i32_0 = arith.constant 0 : i32
    %c0_i32_1 = arith.constant 0 : i32
    return %c0_i32, %c0_i32_0 : i32, i32
  }
  func.func @transform_3(%arg0: i32) -> (i32, i32) {
    %c0_i32 = arith.constant 0 : i32
    %c0_i32_0 = arith.constant 0 : i32
    %c0_i32_1 = arith.constant 0 : i32
    return %c0_i32, %c0_i32_0 : i32, i32
  }
  func.func @transform_4(%arg0: i32) -> (i32, i32) {
    %c0_i32 = arith.constant 0 : i32
    %c0_i32_0 = arith.constant 0 : i32
    %c0_i32_1 = arith.constant 0 : i32
    return %c0_i32, %c0_i32_0 : i32, i32
  }
  func.func @transform_5(%arg0: i32) -> (i32, i32) {
    %c0_i32 = arith.constant 0 : i32
    %c0_i32_0 = arith.constant 0 : i32
    %c0_i32_1 = arith.constant 0 : i32
    return %c0_i32, %c0_i32_0 : i32, i32
  }
  func.func @transform_6(%arg0: i32) -> (i32, i32) {
    %c0_i32 = arith.constant 0 : i32
    %c0_i32_0 = arith.constant 0 : i32
    %c0_i32_1 = arith.constant 0 : i32
    return %c0_i32, %c0_i32_0 : i32, i32
  }
  func.func @transform_7(%arg0: i32) -> (i32, i32) {
    %c0_i32 = arith.constant 0 : i32
    %c0_i32_0 = arith.constant 0 : i32
    %c0_i32_1 = arith.constant 0 : i32
    return %c0_i32, %c0_i32_0 : i32, i32
  }
  func.func @transform_8(%arg0: i32) -> (i32, i32) {
    %c0_i32 = arith.constant 0 : i32
    %c0_i32_0 = arith.constant 0 : i32
    return %arg0, %c0_i32 : i32, i32
  }
  func.func @transform_9(%arg0: i32) -> (i32, i32) {
    %c0_i32 = arith.constant 0 : i32
    %c0_i32_0 = arith.constant 0 : i32
    %c0_i32_1 = arith.constant 0 : i32
    return %c0_i32, %c0_i32_0 : i32, i32
  }
  func.func @transform_10(%arg0: i32) -> (i32, i32) {
    %c0_i32 = arith.constant 0 : i32
    %c0_i32_0 = arith.constant 0 : i32
    %c0_i32_1 = arith.constant 0 : i32
    return %c0_i32, %c0_i32_0 : i32, i32
  }
}

</mosaic_0001>

<bundles_post_ra>
// kernel: attention_decoder_decode.1
= control target key start
LH: loop header
LB: loop body
LE: loop exit
PB: predicated region body
PF: predicated region fallthrough
CT: control target
= control target key end

     0   :  { %v1028_v3 = vmov 0.0|0.0   ;;  %vm1029_vm0 = vmmov 0   ;;  %v1030_v6 = vmov 0.0   ;;  %vm39_vm1 = vcmask 256000   ;;  %s1374_s0 = inlined_call_operand.<no memory space> [shape: f32[1,1], index: 0, kind: input, shape index: {}]   ;;  %s1375_s1 = inlined_call_operand.vmem [shape: f32[3,32], index: 1, kind: input, shape index: {}]   ;;  %s1376_s2 = inlined_call_operand.vmem [shape: f32[3,32], index: 2, kind: input, shape index: {}]   ;;  %s1377_s3 = inlined_call_operand.vmem [shape: f32[8,32], index: 3, kind: input, shape index: {}]   ;;  %s1378_s4 = inlined_call_operand.vmem [shape: f32[64,32], index: 4, kind: input, shape index: {}]   ;;  %s1379_s5 = inlined_call_operand.vmem [shape: f32[192,128], index: 5, kind: input, shape index: {}]   ;;  %s1380_s6 = inlined_call_operand.vmem [shape: f32[64,1], index: 6, kind: input, shape index: {}]   ;;  %s1381_s7 = inlined_call_operand.vmem [shape: f32[7,128], index: 7, kind: input, shape index: {}]   ;;  %s1382_s8 = inlined_call_operand.hbm [shape: f32[1,1], index: 8, kind: output, shape index: {0}]   ;;  %s1383_s9 = inlined_call_operand.vmem [shape: f32[3,32], index: 9, kind: output, shape index: {1}]   ;;  %s1384_s10 = inlined_call_operand.vmem [shape: f32[3,32], index: 10, kind: output, shape index: {2}]  }
   0x1   :  { %v44_v0 = vld [vmem:[%s1378_s4 + $0x20] sm:$0xff]  ;;  %v45_v1 = vld [vmem:[%s1378_s4 + $0x28] sm:$0xff]  ;;  %v46_v2 = vld [vmem:[%s1378_s4 + $0x30] sm:$0xff]  ;;  %907 = vmatprep.subr.bf16.mxu0 %v1028_v3  ;;  %817 = vmatprep.mubr.msk.f32.mxu0 %vm1029_vm0, %v1030_v6 }
   0x2   :  { %v908_v4 = vpack.c.bf16 %v45_v1, %v44_v0  ;;  %v47_v5 = vld [vmem:[%s1378_s4 + $0x38] sm:$0xff]  ;;  %v131_v7 = vld [vmem:[%s1378_s4] sm:$0xff]  ;;  %913 = vmatprep.subr.bf16.mxu1 %v1028_v3  ;;  %v132_v8 = vld [vmem:[%s1378_s4 + $0x8] sm:$0xff]  ;;  %828 = vmatprep.mubr.msk.f32.mxu1 %vm1029_vm0, %v1030_v6 }
   0x3   :  { %v133_v9 = vld [vmem:[%s1378_s4 + $0x10] sm:$0xff]  ;;  %v134_v10 = vld [vmem:[%s1378_s4 + $0x18] sm:$0xff]  ;;  %v911_v11 = vpack.c.bf16 %v47_v5, %v46_v2  ;;  %v914_v12 = vpack.c.bf16 %v132_v8, %v131_v7  ;;  %v38_v13 = vld [vmem:[%s1375_s1] sm:$0x7] }
   0x4   :  { %909 = vmatpush3.bf16.msra.mxu0 %v908_v4 }
   0x5   :  { %17 = vsyncpa [#allocation7], 0  ;;  %910 = vmatprep.subr.bf16.mxu0 %v1028_v3  ;;  %40 = vst.msk [vmem:[#allocation2] sm:$0x7] %vm39_vm1, %v38_v13  ;;  %915 = vmatpush3.bf16.msra.mxu1 %v914_v12  ;;  %v917_v14 = vpack.c.bf16 %v134_v10, %v133_v9  ;;  %v1129_v15 = vld [vmem:[%s1377_s3] sm:$0xff]  ;;  %vm53_vm2 = vcmask 261120   ;;  %v211_v18 = vlaneseq }
   0x6   :  { %916 = vmatprep.subr.bf16.mxu1 %v1028_v3  ;;  %v752_v19 = vld [vmem:[%s1381_s7] ss:$0 sm:$0xff]  ;;  %v755_v30 = vld [vmem:[%s1381_s7 + $0x1] ss:$0 sm:$0xff]  ;;  %s1031_s14 = smov 32   ;;  %v257_v35 = vld [vmem:[%s1379_s5 + $0x8] sm:$0xff] }
   0x7   :  { %v212_v20 = vshrl.u32 %v211_v18, 7  ;;  %v256_v34 = vld [vmem:[%s1379_s5] sm:$0xff]  ;;  %v258_v36 = vld [vmem:[%s1379_s5 + $0x10] sm:$0xff]  ;;  %v259_v38 = vld [vmem:[%s1379_s5 + $0x18] sm:$0xff]  ;;  %vm267_vm3 = vcmask 523264   ;;  %vm705_vm4 = vcmask 1040384  }
   0x8   :  { %912 = vmatpush3.bf16.msra.mxu0 %v911_v11  ;;  %v920_v37 = vpack.c.bf16 %v257_v35, %v256_v34  ;;  %v923_v39 = vpack.c.bf16 %v259_v38, %v258_v36  ;;  %v260_v40 = vld [vmem:[%s1379_s5 + $0x20] sm:$0xff]  ;;  %v261_v41 = vld [vmem:[%s1379_s5 + $0x28] sm:$0xff]  ;;  %v262_v43 = vld [vmem:[%s1379_s5 + $0x30] sm:$0xff]  ;;  %vm707_vm5 = vcmask 1041408   ;;  %s1034_s25 = smov [#allocation6]   ;;  %vm699_vm6 = vcmask 0  }
   0x9   :  { %919 = vmatprep.subr.bf16.mxu0 %v1028_v3  ;;  %918 = vmatpush3.bf16.msra.mxu1 %v917_v14  ;;  %v213_v24 = vsub.s32 0, %v212_v20  ;;  %v926_v42 = vpack.c.bf16 %v261_v41, %v260_v40  ;;  %v263_v44 = vld [vmem:[%s1379_s5 + $0x38] sm:$0xff]  ;;  %v41_v12 = vld [vmem:[%s1376_s2] sm:$0x7]  ;;  %v264_v13 = vld [vmem:[%s1381_s7 + $0x5] sm:$0x1]  ;;  %v265_v14 = vstv %s1374_s0 }
   0xa   :  { %931 = vmatprep.subr.bf16.mxu1 %v1028_v3  ;;  %v929_v45 = vpack.c.bf16 %v263_v44, %v262_v43  ;;  %42 = vst.msk [vmem:[#allocation3] sm:$0x7] %vm39_vm1, %v41_v12  ;;  %s1032_s2 = smov 64   ;;  %v380_v35 = vld [vmem:[%s1379_s5 + $0x40] sm:$0xff]  ;;  %v381_v36 = vld [vmem:[%s1379_s5 + $0x48] sm:$0xff]  ;;  %v501_v12 = vld [vmem:[%s1379_s5 + $0x98] sm:$0xff] }
   0xb   :  { %818 = vmatmul.mubr.msk.f32.vlgmr.msra.gmra.mrb[0].mxu0 %vm53_vm2, %v1129_v15  ;;  %v932_v38 = vpack.c.bf16 %v381_v36, %v380_v35  ;;  %v384_v41 = vld [vmem:[%s1379_s5 + $0x60] sm:$0xff]  ;;  %s736_s26 = sshll.u32 %s1034_s25, 4  ;;  %s737_s26 = int_to_ptr.vmem [resolvable:$true] %s736_s26 }
   0xc   :  { %v1135_v16 = vld [vmem:[#allocation2] sm:$0x7]  ;;  %847 = vmatprep.mubr.msk.f32.mxu0 %vm1029_vm0, %v1030_v6  ;;  %921 = vmatpush3.bf16.msra.mxu0 %v920_v37  ;;  %v382_v37 = vld [vmem:[%s1379_s5 + $0x50] sm:$0xff]  ;;  %p1009_p1 = scmp.lt.s32.totalorder %s737_s26, %s737_s26 }
   0xd   :  { %v136_v17 = vrot.slane %v1135_v16, 2  ;;  %922 = vmatprep.subr.bf16.mxu0 %v1028_v3 }
   0xf   :  { %829 = vmatmul.mubr.msk.f32.vlgmr.msra.gmra.mrb[0].mxu1 %vm53_vm2, %v136_v17 }
  0x10   :  { %866 = vmatprep.mubr.msk.f32.mxu1 %vm1029_vm0, %v1030_v6  ;;  %924 = vmatpush3.bf16.msra.mxu0 %v923_v39  ;;  %v383_v39 = vld [vmem:[%s1379_s5 + $0x58] sm:$0xff] }
  0x11   :  { %925 = vmatprep.subr.bf16.mxu0 %v1028_v3  ;;  %933 = vmatpush3.bf16.msra.mxu1 %v932_v38  ;;  %v935_v40 = vpack.c.bf16 %v383_v39, %v382_v37 }
  0x12   :  { %934 = vmatprep.subr.bf16.mxu1 %v1028_v3 }
  0x14   :  { %927 = vmatpush3.bf16.msra.mxu0 %v926_v42  ;;  %v385_v42 = vld [vmem:[%s1379_s5 + $0x68] sm:$0xff] }
  0x15   :  { %928 = vmatprep.subr.bf16.mxu0 %v1028_v3  ;;  %936 = vmatpush3.bf16.msra.mxu1 %v935_v40  ;;  %v938_v44 = vpack.c.bf16 %v385_v42, %v384_v41 }
  0x16   :  { %937 = vmatprep.subr.bf16.mxu1 %v1028_v3 }
  0x18   :  { %930 = vmatpush3.bf16.msra.mxu0 %v929_v45  ;;  %v386_v45 = vld [vmem:[%s1379_s5 + $0x70] sm:$0xff] }
  0x19   :  { %943 = vmatprep.subr.bf16.mxu0 %v1028_v3  ;;  %939 = vmatpush3.bf16.msra.mxu1 %v938_v44  ;;  %v618_v44 = vld [vmem:[%s1380_s6 + $0x8] sm:$0xff] }
  0x1a   :  { %940 = vmatprep.subr.bf16.mxu1 %v1028_v3 }
  0xde   :  { %v123_v21 = vpop.f32.mrb[0].mxu0 }
  0xdf   :  { %v124_v22 = vadd.f32 %v752_v19, %v123_v21  ;;  %v819_v23 = vpop.f32.mrb[1].mxu0  ;;  %v341_v19 = vld [vmem:[%s1381_s7 + $0x2] sm:$0x1] }
  0xe1   :  { %127 = vst.msk [vmem:[#allocation4] sm:$0xff] %vm53_vm2, %v124_v22 }
  0xe2   :  { %v206_v25 = vpop.f32.mrb[0].mxu1 }
  0xe3   :  { %v830_v26 = vpop.f32.mrb[1].mxu1  ;;  %v214_v27 = vrot.slane %v206_v25, %v213_v24  ;;  %v1206_v24 = vld [vmem:[#allocation3] sm:$0x7] }
  0xe8   :  { %v210_v28 = vld [vmem:[#allocation4] sm:$0xff] }
  0xe9   :  { %v215_v29 = vadd.f32 %v214_v27, %v210_v28 }
  0xeb   :  { %974 = vtanh.f32 %v215_v29 }
  0xf5   :  { %v975_v31 = vpop.eup %974 }
  0xf6   :  { %v222_v32 = vmul.f32 %v975_v31, %v755_v30 }
  0xf8   :  { %v223_v33 = vsel %vm53_vm2, %v222_v32, 0.0 }
  0xf9   :  { %224 = vadd.xlane.f32.xlu0 %v223_v33 }
 0x10f   :  { %252 = vrot.lane.b32.xlu0 %v1135_v16, %s1031_s14 }
 0x186   :  { %v225_v46 = vpop.xlane.xlu0 %224 }
 0x187   :  { %v226_v47 = vrot.slane %v225_v46, 4 }
 0x189   :  { %v227_v48 = vmax.f32 %v225_v46, %v226_v47 }
 0x18a   :  { %v253_v9 = vpop.permute.xlu0 %252 }
 0x18b   :  { %v228_v49 = vrot.slane %v227_v48, 2 }
 0x18d   :  { %v229_v50 = vmax.f32 %v227_v48, %v228_v49  ;;  %v469_v48 = vrot.slane %v1206_v24, 1 }
 0x18f   :  { %v230_v51 = vrot.slane %v229_v50, 1  ;;  %470 = vrot.lane.b32.xlu0 %v469_v48, %s1031_s14 }
 0x191   :  { %v231_v52 = vmax.f32 %v229_v50, %v230_v51  ;;  %v375_v51 = vrot.slane %v1135_v16, 1  ;;  %v506_v16 = vld [vmem:[%s1381_s7 + $0x4] sm:$0x1] }
 0x193   :  { %v232_v53 = vsub.f32 %v225_v46, %v231_v52  ;;  %v387_v46 = vld [vmem:[%s1379_s5 + $0x78] sm:$0xff] }
 0x194   :  { %v941_v47 = vpack.c.bf16 %v387_v46, %v386_v45  ;;  %v619_v45 = vld [vmem:[%s1380_s6 + $0x10] sm:$0xff] }
 0x195   :  { %v233_v54 = vmul.f32 1.442695, %v232_v53 }
 0x196   :  { %942 = vmatpush3.bf16.msra.mxu1 %v941_v47  ;;  %v620_v47 = vld [vmem:[%s1380_s6 + $0x18] sm:$0xff] }
 0x197   :  { %976 = vpow2.f32 %v233_v54  ;;  %955 = vmatprep.subr.bf16.mxu1 %v1028_v3  ;;  %v959_v48 = vpack.c.bf16 %v620_v47, %v619_v45 }
 0x1a1   :  { %v977_v55 = vpop.eup %976 }
 0x1a2   :  { %v235_v56 = vrot.slane %v977_v55, 4  ;;  %v241_v57 = vmul.f32 %v977_v55, %v1129_v15  ;;  %v266_v15 = vmul.f32 %v265_v14, %v264_v13  ;;  %v502_v14 = vld [vmem:[%s1379_s5 + $0xa0] sm:$0xff] }
 0x1a4   :  { %v236_v58 = vadd.f32 %v977_v55, %v235_v56  ;;  %v242_v59 = vsel %vm53_vm2, %v241_v57, 0.0  ;;  %v388_v55 = vld [vmem:[%s1381_s7 + $0x3] sm:$0x1] }
 0x1a5   :  { %v243_v60 = vrot.slane %v242_v59, 4 }
 0x1a6   :  { %v237_v61 = vrot.slane %v236_v58, 2 }
 0x1a7   :  { %v244_v62 = vadd.f32 %v243_v60, %v242_v59 }
 0x1a8   :  { %v238_v63 = vadd.f32 %v237_v61, %v236_v58 }
 0x1a9   :  { %v245_v1 = vrot.slane %v244_v62, 2 }
 0x1aa   :  { %v239_v0 = vrot.slane %v238_v63, 1 }
 0x1ab   :  { %v246_v4 = vadd.f32 %v245_v1, %v244_v62 }
 0x1ac   :  { %v240_v2 = vadd.f32 %v239_v0, %v238_v63 }
 0x1ad   :  { %v247_v5 = vrot.slane %v246_v4, 1 }
 0x1ae   :  { %978 = vrcp.f32 %v240_v2 }
 0x1af   :  { %v248_v7 = vadd.f32 %v247_v5, %v246_v4 }
 0x1b8   :  { %v979_v8 = vpop.eup %978 }
 0x1b9   :  { %v1185_v10 = vmul.f32 %v979_v8, %v248_v7  ;;  %v498_v7 = vld [vmem:[%s1379_s5 + $0x80] sm:$0xff]  ;;  %v499_v8 = vld [vmem:[%s1379_s5 + $0x88] sm:$0xff] }
 0x1bb   :  { %v255_v11 = vsel %vm53_vm2, %v1185_v10, %v253_v9  ;;  %v500_v9 = vld [vmem:[%s1379_s5 + $0x90] sm:$0xff] }
 0x1bc   :  { %848 = vmatmul.mubr.msk.f32.vlgmr.msra.gmra.mrb[2].mxu0 %vm267_vm3, %v255_v11  ;;  %v944_v11 = vpack.c.bf16 %v499_v8, %v498_v7  ;;  %v947_v13 = vpack.c.bf16 %v501_v12, %v500_v9 }
 0x1bd   :  { %885 = vmatprep.mubr.msk.f32.mxu0 %vm1029_vm0, %v1030_v6 }
 0x1be   :  { %945 = vmatpush3.bf16.msra.mxu0 %v944_v11 }
 0x1bf   :  { %946 = vmatprep.subr.bf16.mxu0 %v1028_v3 }
 0x1c2   :  { %948 = vmatpush3.bf16.msra.mxu0 %v947_v13 }
 0x1c3   :  { %949 = vmatprep.subr.bf16.mxu0 %v1028_v3 }
 0x28f   :  { %v337_v18 = vpop.f32.mrb[2].mxu0 }
 0x290   :  { %v338_v20 = vadd.f32 %v337_v18, %v266_v15  ;;  %v849_v21 = vpop.f32.mrb[3].mxu0  ;;  %v503_v15 = vld [vmem:[%s1379_s5 + $0xa8] sm:$0xff] }
 0x291   :  { %v950_v18 = vpack.c.bf16 %v503_v15, %v502_v14 }
 0x292   :  { %v342_v22 = vadd.f32 %v341_v19, %v338_v20  ;;  %v504_v19 = vld [vmem:[%s1379_s5 + $0xb0] sm:$0xff]  ;;  %v505_v20 = vld [vmem:[%s1379_s5 + $0xb8] sm:$0xff]  ;;  %s1008_s5 = scalar_lea.vmem %s737_s26, 32 }
 0x293   :  { %951 = vmatpush3.bf16.msra.mxu0 %v950_v18 }
 0x294   :  { %980 = vtanh.f32 %v342_v22  ;;  %v757_v25 = vmul.f32 -1.442695, %v342_v22  ;;  %v953_v22 = vpack.c.bf16 %v505_v20, %v504_v19  ;;  %952 = vmatprep.subr.bf16.mxu0 %v1028_v3 }
 0x296   :  { %982 = vpow2.f32 %v757_v25 }
 0x297   :  { %954 = vmatpush3.bf16.msra.mxu0 %v953_v22 }
 0x29e   :  { %v981_v23 = vpop.eup %980 }
 0x29f   :  { %356 = vrot.lane.b32.xlu1 %v981_v23, %s1032_s2  ;;  %v587_v23 = vrot.slane %v1206_v24, 2 }
 0x2a0   :  { %v983_v26 = vpop.eup %982 }
 0x2a1   :  { %v346_v27 = vadd.f32 1.0, %v983_v26 }
 0x2a3   :  { %351 = vrot.lane.b32.xlu1 %v1206_v24, %s1031_s14  ;;  %984 = vrcp.f32 %v346_v27 }
 0x2ad   :  { %v985_v28 = vpop.eup %984 }
 0x311   :  { %v357_v29 = vpop.permute.xlu1 %356 }
 0x312   :  { %v359_v30 = vmul.f32 %v985_v28, %v357_v29 }
 0x314   :  { %361 = vrot.lane.b32.xlu1 %v359_v30, %s1031_s14 }
 0x315   :  { %v352_v31 = vpop.permute.xlu1 %351 }
 0x316   :  { %v354_v32 = vmul.f32 %v985_v28, %v352_v31 }
 0x386   :  { %v362_v33 = vpop.permute.xlu1 %361 }
 0x387   :  { %v1211_v34 = vadd.f32 %v362_v33, %v354_v32 }
 0x389   :  { %986 = vtanh.f32 %v1211_v34 }
 0x393   :  { %v987_v43 = vpop.eup %986 }
 0x394   :  { %367 = vrot.lane.b32.xlu1 %v987_v43, %s1032_s2  ;;  %v617_v43 = vld [vmem:[%s1380_s6] sm:$0xff] }
 0x395   :  { %v956_v46 = vpack.c.bf16 %v618_v44, %v617_v43 }
 0x406   :  { %v368_v49 = vpop.permute.xlu1 %367 }
 0x407   :  { %v1245_v50 = vmul.f32 %v985_v28, %v368_v49 }
 0x409   :  { %372 = vrot.lane.b32.xlu1 %v1245_v50, %s1031_s14 }
 0x40d   :  { %376 = vrot.lane.b32.xlu1 %v375_v51, %s1031_s14  ;;  %v621_v51 = vld [vmem:[%s1380_s6 + $0x20] sm:$0xff] }
 0x47b   :  { %v373_v52 = vpop.permute.xlu1 %372 }
 0x47f   :  { %v377_v53 = vpop.permute.xlu1 %376 }
 0x480   :  { %v379_v54 = vsel %vm53_vm2, %v373_v52, %v377_v53  ;;  %v622_v52 = vld [vmem:[%s1380_s6 + $0x28] sm:$0xff] }
 0x481   :  { %867 = vmatmul.mubr.msk.f32.vlgmr.msra.gmra.mrb[2].mxu1 %vm267_vm3, %v379_v54  ;;  %v962_v54 = vpack.c.bf16 %v622_v52, %v621_v51 }
 0x482   :  { %904 = vmatprep.mubr.msk.f32.mxu1 %vm1029_vm0, %v1030_v6  ;;  %v471_v6 = vpop.permute.xlu0 %470  ;;  %957 = vmatpush3.bf16.msra.mxu1 %v956_v46 }
 0x483   :  { %958 = vmatprep.subr.bf16.mxu1 %v1028_v3 }
 0x486   :  { %960 = vmatpush3.bf16.msra.mxu1 %v959_v48 }
 0x487   :  { %961 = vmatprep.subr.bf16.mxu1 %v1028_v3 }
 0x48a   :  { %963 = vmatpush3.bf16.msra.mxu1 %v962_v54 }
 0x48b   :  { %964 = vmatprep.subr.bf16.mxu1 %v1028_v3 }
 0x554   :  { %v458_v56 = vpop.f32.mrb[2].mxu1 }
 0x555   :  { %v459_v57 = vadd.f32 %v458_v56, %v388_v55  ;;  %v868_v58 = vpop.f32.mrb[3].mxu1  ;;  %v623_v56 = vld [vmem:[%s1380_s6 + $0x30] sm:$0xff] }
 0x557   :  { %988 = vtanh.f32 %v459_v57  ;;  %v759_v60 = vmul.f32 -1.442695, %v459_v57  ;;  %v624_v57 = vld [vmem:[%s1380_s6 + $0x38] sm:$0xff] }
 0x559   :  { %990 = vpow2.f32 %v759_v60 }
 0x561   :  { %v989_v59 = vpop.eup %988 }
 0x562   :  { %475 = vrot.lane.b32.xlu1 %v989_v59, %s1032_s2  ;;  %v965_v59 = vpack.c.bf16 %v624_v57, %v623_v56 }
 0x563   :  { %v991_v61 = vpop.eup %990 }
 0x564   :  { %v465_v62 = vadd.f32 1.0, %v991_v61  ;;  %966 = vmatpush3.bf16.msra.mxu1 %v965_v59 }
 0x566   :  { %992 = vrcp.f32 %v465_v62 }
 0x570   :  { %v993_v63 = vpop.eup %992 }
 0x571   :  { %v473_v2 = vmul.f32 %v993_v63, %v471_v6 }
 0x5d4   :  { %v476_v0 = vpop.permute.xlu1 %475 }
 0x5d5   :  { %v478_v1 = vmul.f32 %v993_v63, %v476_v0 }
 0x5d7   :  { %480 = vrot.lane.b32.xlu1 %v478_v1, %s1031_s14 }
 0x649   :  { %v481_v4 = vpop.permute.xlu1 %480 }
 0x64a   :  { %v1260_v5 = vadd.f32 %v481_v4, %v473_v2 }
 0x64c   :  { %994 = vtanh.f32 %v1260_v5  ;;  %v710_v53 = vrot.slane %v1260_v5, 7 }
 0x64e   :  { %v715_v58 = vsel %vm705_vm4, %v1211_v34, %v710_v53 }
 0x656   :  { %v995_v21 = vpop.eup %994 }
 0x657   :  { %486 = vrot.lane.b32.xlu0 %v995_v21, %s1032_s2 }
 0x65b   :  { %494 = vrot.lane.b32.xlu0 %v136_v17, %s1031_s14 }
 0x65f   :  { %588 = vrot.lane.b32.xlu0 %v587_v23, %s1031_s14 }
 0x6c9   :  { %v487_v25 = vpop.permute.xlu0 %486 }
 0x6ca   :  { %v1296_v26 = vmul.f32 %v993_v63, %v487_v25 }
 0x6cc   :  { %491 = vrot.lane.b32.xlu1 %v1296_v26, %s1031_s14  ;;  %v701_v61 = vrot.slane %v1296_v26, 7 }
 0x6cd   :  { %v495_v27 = vpop.permute.xlu0 %494 }
 0x6ce   :  { %v706_v34 = vsel %vm705_vm4, %v1245_v50, %v701_v61  ;;  %v625_v50 = vld [vmem:[%s1381_s7 + $0x6] sm:$0x1] }
 0x6d1   :  { %v589_v39 = vpop.permute.xlu0 %588 }
 0x73e   :  { %v492_v28 = vpop.permute.xlu1 %491 }
 0x73f   :  { %v497_v29 = vsel %vm53_vm2, %v492_v28, %v495_v27 }
 0x740   :  { %886 = vmatmul.mubr.msk.f32.vlgmr.msra.gmra.mrb[4].mxu0 %vm267_vm3, %v497_v29 }
 0x813   :  { %v576_v17 = vpop.f32.mrb[4].mxu0 }
 0x814   :  { %v577_v24 = vadd.f32 %v576_v17, %v506_v16  ;;  %v887_v30 = vpop.f32.mrb[5].mxu0 }
 0x816   :  { %996 = vtanh.f32 %v577_v24  ;;  %v761_v32 = vmul.f32 -1.442695, %v577_v24 }
 0x818   :  { %998 = vpow2.f32 %v761_v32 }
 0x820   :  { %v997_v31 = vpop.eup %996 }
 0x821   :  { %593 = vrot.lane.b32.xlu1 %v997_v31, %s1032_s2 }
 0x822   :  { %v999_v33 = vpop.eup %998 }
 0x823   :  { %v583_v35 = vadd.f32 1.0, %v999_v33 }
 0x825   :  { %1000 = vrcp.f32 %v583_v35 }
 0x82f   :  { %v1001_v36 = vpop.eup %1000 }
 0x830   :  { %v591_v40 = vmul.f32 %v1001_v36, %v589_v39 }
 0x893   :  { %v594_v37 = vpop.permute.xlu1 %593 }
 0x894   :  { %v596_v38 = vmul.f32 %v1001_v36, %v594_v37 }
 0x896   :  { %598 = vrot.lane.b32.xlu1 %v596_v38, %s1031_s14 }
 0x908   :  { %v599_v41 = vpop.permute.xlu1 %598 }
 0x909   :  { %v601_v42 = vadd.f32 %v599_v41, %v591_v40 }
 0x90b   :  { %1002 = vtanh.f32 %v601_v42  ;;  %v713_v55 = vrot.slane %v601_v42, 6 }
 0x90d   :  { %v716_v60 = vsel %vm707_vm5, %v715_v58, %v713_v55 }
 0x915   :  { %v1003_v49 = vpop.eup %1002 }
 0x916   :  { %604 = vrot.lane.b32.xlu0 %v1003_v49, %s1032_s2  ;;  %s1033_s2 = smov 96  }
 0x91a   :  { %613 = vrot.lane.b32.xlu0 %v1185_v10, %s1031_s14 }
 0x91e   :  { %724 = vrot.lane.b32.xlu0 %v716_v60, %s1033_s2 }
 0x988   :  { %v605_v62 = vpop.permute.xlu0 %604 }
 0x989   :  { %v607_v63 = vmul.f32 %v1001_v36, %v605_v62 }
 0x98b   :  { %v703_v0 = vrot.slane %v607_v63, 6  ;;  %609 = vrot.lane.b32.xlu1 %v607_v63, %s1031_s14 }
 0x98c   :  { %v614_v10 = vpop.permute.xlu0 %613 }
 0x98d   :  { %v708_v1 = vsel %vm707_vm5, %v706_v34, %v703_v0 }
 0x98f   :  { %718 = vrot.lane.b32.xlu1 %v708_v1, %s1031_s14 }
 0x990   :  { %v725_v6 = vpop.permute.xlu0 %724 }
 0x991   :  { %727 = vst.msk [vmem:[#allocation3] sm:$0x7] %vm39_vm1, %v725_v6  ;;  %729 = vst.msk [vmem:[%s1384_s10] sm:$0x7] %vm39_vm1, %v725_v6  ;;  %s1004_s10 = scalar_lea.vmem %s737_s26, 16 }
 0x992   :  { %p1005_p0 = scmp.ne.s32.totalorder %s737_s26, %s1004_s10  ;;  %p1010_p2 = scmp.lt.s32.totalorder %s1008_s5, %s1004_s10 }
 0x994   :  { %p1011_p3 = por %p1010_p2, %p1009_p1 }
 0x996   :  { %p1012_p4 = pnand %p1011_p3, %p1005_p0 }
 0x9fd   :  { %v610_v3 = vpop.permute.xlu1 %609 }
 0x9fe   :  { %v616_v2 = vsel %vm53_vm2, %v610_v3, %v614_v10 }
 0x9ff   :  { %905 = vmatmul.mubr.msk.f32.vlgmr.msra.gmra.mrb[4].mxu1 %vm267_vm3, %v616_v2 }
 0xa01   :  { %v719_v4 = vpop.permute.xlu1 %718 }
 0xa02   :  { %722 = vst.msk [vmem:[#allocation2] sm:$0x7] %vm39_vm1, %v719_v4  ;;  %728 = vst.msk [vmem:[%s1383_s9] sm:$0x7] %vm39_vm1, %v719_v4 }
 0xad2   :  { %v695_v5 = vpop.f32.mrb[4].mxu1 }
 0xad3   :  { %v696_v7 = vadd.f32 %v695_v5, %v625_v50  ;;  %v906_v8 = vpop.f32.mrb[5].mxu1 }
 0xad5   :  { %700 = vst.msk [vmem:[#allocation6] sm:$0x1] %vm699_vm6, %v696_v7 }
 0xad6   :  { %1015 = shalt.err (!%p1012_p4)
}
 0xad7   :  { %s1016_s7 = scalar_lea.hbm %s1382_s8, 16 }
 0xad8   :  { %p1017_p5 = scmp.ne.s32.totalorder %s1382_s8, %s1016_s7  ;;  %p1020_p6 = scmp.lt.u32.totalorder %s1016_s7, %s1382_s8 }
 0xada   :  { %p1022_p7 = pnand %p1020_p6, %p1017_p5 }
 0xadc   :  { %1025 = shalt.err (!%p1022_p7)
}
 0xadd   :  { %739 = dma.vmem_to_hbm [thread:$0]  %s737_s26, 16, %s1382_s8, [#allocation7]  }
 0xade   :  { %1026 = dma.done.wait [#allocation7], 16  }
 0xadf   :  { %1027 = vsyncadd [#allocation7], 4294967280 }
 0xae0   :  { %751 = vsyncpa [#allocation7], 1 }

</bundles_post_ra>
